<compile_context>
chip_gen: v7x
topology: tpu7x:2x2x1
jax: 0.10.0
libtpu: 0.0.40
codegen_flags: <defaults>
</compile_context>

<pallas_src>
import jax
import jax.numpy as jnp
import numpy as np
from jax.experimental import pallas as pl
from jax.experimental.pallas import tpu as pltpu

LANE = 128
SUBLANE = 8


def _round_up(n, m):
    return ((n + m - 1) // m) * m


def _elu(v):
    # ELU with alpha=1: v if v > 0 else exp(v) - 1   (computed in f32, v5e-safe)
    return jnp.where(v > 0, v, jnp.exp(v) - 1.0)


def cifra_mlp_kernel(x_ref,
                     w1_ref, b1_ref,
                     w2_ref, b2_ref,
                     w3_ref, b3_ref,
                     w4_ref, b4_ref,
                     o_ref):
    # x arrives in its native dtype (f32 or bf16); cast to bf16 on the VPU here instead of a
    # separate wrapper-side XLA pad/cast pass (saves one full HBM round trip over x).
    x = x_ref[...].astype(jnp.bfloat16)

    # fc1 + ELU   (dropout1 = identity in eval mode)
    h = _elu(jnp.dot(x, w1_ref[...], preferred_element_type=jnp.float32) + b1_ref[...])
    # fc2 + ELU   (dropout2 = identity in eval mode)
    h = _elu(jnp.dot(h.astype(jnp.bfloat16), w2_ref[...],
                     preferred_element_type=jnp.float32) + b2_ref[...])
    # fc3 + ELU
    h = _elu(jnp.dot(h.astype(jnp.bfloat16), w3_ref[...],
                     preferred_element_type=jnp.float32) + b3_ref[...])
    # fc4 (no activation)
    out = jnp.dot(h.astype(jnp.bfloat16), w4_ref[...],
                  preferred_element_type=jnp.float32) + b4_ref[...]

    # Lane-dense store; padded lanes are exact zeros (zero-padded weights/biases).
    o_ref[...] = out.astype(o_ref.dtype)


def prepare_params(params):
    """One-time prep: transpose PyTorch [out,in] weights to [in,out], pad every feature dim to a
    128-lane multiple, cast weights to bf16 (MXU operands) and biases to f32 [1, out_padded].
    Zero padding is exact: padded lanes stay 0 through ELU and contribute nothing."""
    prepped = {}
    for name in ("fc1", "fc2", "fc3", "fc4"):
        w, b = params[name]                      # w: [out, in] (PyTorch), b: [out]
        out_f, in_f = w.shape
        in_p, out_p = _round_up(in_f, LANE), _round_up(out_f, LANE)
        wt = jnp.zeros((in_p, out_p), jnp.bfloat16).at[:in_f, :out_f].set(
            w.T.astype(jnp.bfloat16))
        bp = jnp.zeros((1, out_p), jnp.float32).at[0, :out_f].set(b.astype(jnp.float32))
        prepped[name] = (wt, bp)
    prepped["in_dim"] = params["fc1"][0].shape[1]
    prepped["out_dim"] = params["fc4"][0].shape[0]
    return prepped


def cifra_mlp_forward(x, prepared, *, batch_tile=512, out_dtype=jnp.bfloat16):
    """x: [B, input_dim] (f32 or bf16). prepared: output of prepare_params().
    Returns [B, output_dim] in out_dtype (bf16 by default; f32 accumulation inside)."""
    B, in_dim = x.shape
    assert in_dim == prepared["in_dim"]
    out_dim = prepared["out_dim"]

    layers = [prepared[n] for n in ("fc1", "fc2", "fc3", "fc4")]
    (w1, b1), (w2, b2), (w3, b3), (w4, b4) = layers
    IN_P = w1.shape[0]
    OUT_P = w4.shape[1]

    # Batch tile: multiple of 8 (sublanes), clamped to the (8-rounded) batch.  For large
    # batches keep it a multiple of 256 (default 512) so the 256-wide MXUs (v6e/v7x) are full;
    # on v7x pick it so the grid length is even for balanced megacore sharding.
    TB = max(SUBLANE, (int(batch_tile) // SUBLANE) * SUBLANE)
    TB = min(TB, _round_up(B, SUBLANE))
    nb = pl.cdiv(B, TB)

    # Feature axis is lane-padded only when needed (CIFAR's 3072 already is a 128 multiple).
    x_in = x if in_dim == IN_P else jnp.pad(x, ((0, 0), (0, IN_P - in_dim)))

    out_itemsize = np.dtype(out_dtype).itemsize
    wb_bytes = sum(int(w.size) * w.dtype.itemsize + int(b.size) * b.dtype.itemsize
                   for w, b in layers)

    # ---- cost estimate (advisory, from true padded dims) ----
    rows = nb * TB
    macs = sum(w.shape[0] * w.shape[1] for w, _ in layers)
    elu_lanes = sum(w.shape[1] for w, _ in layers[:3])
    cost = pl.CostEstimate(
        flops=int(2 * rows * macs),
        transcendentals=int(rows * elu_lanes),
        bytes_accessed=int(int(x_in.size) * x_in.dtype.itemsize + wb_bytes
                           + B * OUT_P * out_itemsize))

    # ---- explicit VMEM budget so larger tiles are actually realizable ----
    widths = [w.shape[1] for w, _ in layers]
    vmem_need = (
        2 * TB * IN_P * x_in.dtype.itemsize        # double-buffered x tile
        + 2 * TB * OUT_P * out_itemsize            # double-buffered out tile
        + 2 * wb_bytes                             # weights/biases (worst case: double-buffered)
        + 4 * TB * max(widths) * 4                 # f32 intermediates headroom
    )
    # +25% headroom; floor at 32 MiB (harmless), cap at 64 MiB so it is safe on v7x.
    vmem_limit = int(min(max(vmem_need * 5 // 4, 32 * 2**20), 64 * 2**20))

    operands = (x_in, w1, b1, w2, b2, w3, b3, w4, b4)

    def build(single_buffer_weights):
        def resident(arr):
            # Constant block index -> fetched once, stays resident in VMEM across the grid.
            # Shapes come from the actual prepared arrays (fixes the old fc3 shape bug).
            if single_buffer_weights:
                return pl.BlockSpec(arr.shape, lambda i: (0, 0),
                                    pipeline_mode=pl.Buffered(1))
            return pl.BlockSpec(arr.shape, lambda i: (0, 0))

        return pl.pallas_call(
            cifra_mlp_kernel,
            out_shape=jax.ShapeDtypeStruct((B, OUT_P), out_dtype),
            grid=(nb,),
            in_specs=[pl.BlockSpec((TB, IN_P), lambda i: (i, 0))]   # x: pipelined over batch
                     + [resident(a) for a in operands[1:]],
            out_specs=pl.BlockSpec((TB, OUT_P), lambda i: (i, 0)),
            compiler_params=pltpu.CompilerParams(
                dimension_semantics=("parallel",),   # megacore-shardable batch axis (v7x)
                vmem_limit_bytes=vmem_limit),
            cost_estimate=cost,
        )

    try:
        out_full = build(single_buffer_weights=True)(*operands)
    except Exception:
        # TODO(synk): some Pallas builds reject pipeline_mode=pl.Buffered(1); fall back to the
        # default double-buffered resident weights (costs a few MiB of VMEM, otherwise identical).
        out_full = build(single_buffer_weights=False)(*operands)

    return out_full[:, :out_dim]


def init_params(key, input_dim, hidden1, hidden2, output_dim):
    """Deterministic param init mirroring the module's shapes (PyTorch layout).
    Weights: kaiming-normal (fan_in, relu gain). Biases: PyTorch Linear default uniform."""
    dims = [(input_dim, hidden1), (hidden1, hidden2), (hidden2, hidden2), (hidden2, output_dim)]
    names = ["fc1", "fc2", "fc3", "fc4"]
    params = {}
    for name, (fan_in, fan_out) in zip(names, dims):
        key, kw, kb = jax.random.split(key, 3)
        std = (2.0 / fan_in) ** 0.5
        w = std * jax.random.normal(kw, (fan_out, fan_in), dtype=jnp.float32)
        bound = 1.0 / (fan_in ** 0.5)
        b = jax.random.uniform(kb, (fan_out,), minval=-bound, maxval=bound, dtype=jnp.float32)
        params[name] = (w, b)
    return params


def reference_forward(x, params):
    """Pure-JAX f32 reference of the PyTorch forward (eval-mode dropout = identity)."""
    def elu(v):
        return jnp.where(v > 0, v, jnp.exp(v) - 1.0)
    (w1, b1), (w2, b2), (w3, b3), (w4, b4) = (
        params["fc1"], params["fc2"], params["fc3"], params["fc4"]
    )
    h = elu(x @ w1.T + b1)
    h = elu(h @ w2.T + b2)
    h = elu(h @ w3.T + b3)
    return h @ w4.T + b4


if __name__ == "__main__":
    key = jax.random.PRNGKey(0)
    kx, kp, kx2 = jax.random.split(key, 3)

    # hidden1 != hidden2 on purpose: exercises the formerly buggy fc3 BlockSpec path.
    batch, input_dim, hidden1, hidden2, output_dim = 8, 32, 256, 128, 10

    x = jax.random.normal(kx, (batch, input_dim), dtype=jnp.float32)
    params = init_params(kp, input_dim, hidden1, hidden2, output_dim)

    # One-time parameter prep (transpose + pad + bf16 cast) — NOT per forward call.
    prepared = prepare_params(params)

    out = cifra_mlp_forward(x, prepared)          # default batch_tile=512, clamps to batch here
    out = jax.block_until_ready(out)
    ref = reference_forward(x, params)
    assert out.shape == (batch, output_dim)
    # bf16 matmul operands + bf16 output store with f32 accumulation: loose tolerance vs f32 ref.
    err = jnp.max(jnp.abs(out.astype(jnp.float32) - ref))
    assert jnp.allclose(out.astype(jnp.float32), ref, atol=5e-2, rtol=5e-2), float(err)

    # Multi-step grid + partial final batch tile (B % TB != 0) path.
    batch2 = 20
    x2 = jax.random.normal(kx2, (batch2, input_dim), dtype=jnp.float32)
    out2 = jax.block_until_ready(cifra_mlp_forward(x2, prepared, batch_tile=16))
    ref2 = reference_forward(x2, params)
    assert out2.shape == (batch2, output_dim)
    err2 = jnp.max(jnp.abs(out2.astype(jnp.float32) - ref2))
    assert jnp.allclose(out2.astype(jnp.float32), ref2, atol=5e-2, rtol=5e-2), float(err2)

    print("KERNEL_OK")
</pallas_src>

<mosaic_0001>
module attributes {stable_mosaic.version = 11 : i64} {
  func.func @cifra_mlp_kernel(%arg0: i32, %arg1: memref<8x128xf32, #tpu.memory_space<vmem>>, %arg2: memref<128x256xbf16, #tpu.memory_space<vmem>>, %arg3: memref<1x256xf32, #tpu.memory_space<vmem>>, %arg4: memref<256x128xbf16, #tpu.memory_space<vmem>>, %arg5: memref<1x128xf32, #tpu.memory_space<vmem>>, %arg6: memref<128x128xbf16, #tpu.memory_space<vmem>>, %arg7: memref<1x128xf32, #tpu.memory_space<vmem>>, %arg8: memref<128x128xbf16, #tpu.memory_space<vmem>>, %arg9: memref<1x128xf32, #tpu.memory_space<vmem>>, %arg10: memref<8x128xbf16, #tpu.memory_space<vmem>>) attributes {dimension_semantics = [#tpu.dimension_semantics<parallel>], iteration_bounds = array<i64: 1>, scalar_prefetch = 0 : i64, scratch_operands = 0 : i64, tpu.core_type = #tpu.core_type<tc>, window_params = [{transform_indices = @transform_0, window_bounds = array<i64: 8, 128>}, {pipeline_mode = #tpu.pipeline_mode<synchronous>, transform_indices = @transform_1, window_bounds = array<i64: 128, 256>}, {pipeline_mode = #tpu.pipeline_mode<synchronous>, transform_indices = @transform_2, window_bounds = array<i64: 1, 256>}, {pipeline_mode = #tpu.pipeline_mode<synchronous>, transform_indices = @transform_3, window_bounds = array<i64: 256, 128>}, {pipeline_mode = #tpu.pipeline_mode<synchronous>, transform_indices = @transform_4, window_bounds = array<i64: 1, 128>}, {pipeline_mode = #tpu.pipeline_mode<synchronous>, transform_indices = @transform_5, window_bounds = array<i64: 128, 128>}, {pipeline_mode = #tpu.pipeline_mode<synchronous>, transform_indices = @transform_6, window_bounds = array<i64: 1, 128>}, {pipeline_mode = #tpu.pipeline_mode<synchronous>, transform_indices = @transform_7, window_bounds = array<i64: 128, 128>}, {pipeline_mode = #tpu.pipeline_mode<synchronous>, transform_indices = @transform_8, window_bounds = array<i64: 1, 128>}, {transform_indices = @transform_9, window_bounds = array<i64: 8, 128>}]} {
    %c0 = arith.constant 0 : index
    %c0_0 = arith.constant 0 : index
    %0 = vector.load %arg1[%c0, %c0_0] : memref<8x128xf32, #tpu.memory_space<vmem>>, vector<8x128xf32>
    %1 = arith.truncf %0 : vector<8x128xf32> to vector<8x128xbf16>
    %c0_1 = arith.constant 0 : index
    %c0_2 = arith.constant 0 : index
    %2 = vector.load %arg2[%c0_1, %c0_2] : memref<128x256xbf16, #tpu.memory_space<vmem>>, vector<128x256xbf16>
    %cst = arith.constant dense<0.000000e+00> : vector<8x256xf32>
    %3 = tpu.matmul %1, %2, %cst {dimension_numbers = #tpu.dot_dimension_numbers<[1], [0], [0], [1], [0, 0, 1, 1], [], []>} : vector<8x128xbf16>, vector<128x256xbf16>, vector<8x256xf32> -> vector<8x256xf32>
    %c0_3 = arith.constant 0 : index
    %c0_4 = arith.constant 0 : index
    %4 = vector.load %arg3[%c0_3, %c0_4] : memref<1x256xf32, #tpu.memory_space<vmem>>, vector<1x256xf32>
    %5 = vector.broadcast %4 : vector<1x256xf32> to vector<8x256xf32>
    %6 = arith.addf %3, %5 : vector<8x256xf32>
    %cst_5 = arith.constant 0.000000e+00 : f32
    %7 = vector.broadcast %cst_5 : f32 to vector<8x256xf32>
    %8 = arith.cmpf ogt, %6, %7 : vector<8x256xf32>
    %9 = math.exp %6 : vector<8x256xf32>
    %cst_6 = arith.constant 1.000000e+00 : f32
    %10 = vector.broadcast %cst_6 : f32 to vector<8x256xf32>
    %11 = arith.subf %9, %10 : vector<8x256xf32>
    %12 = arith.select %8, %6, %11 : vector<8x256xi1>, vector<8x256xf32>
    %13 = arith.truncf %12 : vector<8x256xf32> to vector<8x256xbf16>
    %c0_7 = arith.constant 0 : index
    %c0_8 = arith.constant 0 : index
    %14 = vector.load %arg4[%c0_7, %c0_8] : memref<256x128xbf16, #tpu.memory_space<vmem>>, vector<256x128xbf16>
    %cst_9 = arith.constant dense<0.000000e+00> : vector<8x128xf32>
    %15 = tpu.matmul %13, %14, %cst_9 {dimension_numbers = #tpu.dot_dimension_numbers<[1], [0], [0], [1], [0, 0, 1, 1], [], []>} : vector<8x256xbf16>, vector<256x128xbf16>, vector<8x128xf32> -> vector<8x128xf32>
    %c0_10 = arith.constant 0 : index
    %c0_11 = arith.constant 0 : index
    %16 = vector.load %arg5[%c0_10, %c0_11] : memref<1x128xf32, #tpu.memory_space<vmem>>, vector<1x128xf32>
    %17 = vector.broadcast %16 : vector<1x128xf32> to vector<8x128xf32>
    %18 = arith.addf %15, %17 : vector<8x128xf32>
    %cst_12 = arith.constant 0.000000e+00 : f32
    %19 = vector.broadcast %cst_12 : f32 to vector<8x128xf32>
    %20 = arith.cmpf ogt, %18, %19 : vector<8x128xf32>
    %21 = math.exp %18 : vector<8x128xf32>
    %cst_13 = arith.constant 1.000000e+00 : f32
    %22 = vector.broadcast %cst_13 : f32 to vector<8x128xf32>
    %23 = arith.subf %21, %22 : vector<8x128xf32>
    %24 = arith.select %20, %18, %23 : vector<8x128xi1>, vector<8x128xf32>
    %25 = arith.truncf %24 : vector<8x128xf32> to vector<8x128xbf16>
    %c0_14 = arith.constant 0 : index
    %c0_15 = arith.constant 0 : index
    %26 = vector.load %arg6[%c0_14, %c0_15] : memref<128x128xbf16, #tpu.memory_space<vmem>>, vector<128x128xbf16>
    %cst_16 = arith.constant dense<0.000000e+00> : vector<8x128xf32>
    %27 = tpu.matmul %25, %26, %cst_16 {dimension_numbers = #tpu.dot_dimension_numbers<[1], [0], [0], [1], [0, 0, 1, 1], [], []>} : vector<8x128xbf16>, vector<128x128xbf16>, vector<8x128xf32> -> vector<8x128xf32>
    %c0_17 = arith.constant 0 : index
    %c0_18 = arith.constant 0 : index
    %28 = vector.load %arg7[%c0_17, %c0_18] : memref<1x128xf32, #tpu.memory_space<vmem>>, vector<1x128xf32>
    %29 = vector.broadcast %28 : vector<1x128xf32> to vector<8x128xf32>
    %30 = arith.addf %27, %29 : vector<8x128xf32>
    %cst_19 = arith.constant 0.000000e+00 : f32
    %31 = vector.broadcast %cst_19 : f32 to vector<8x128xf32>
    %32 = arith.cmpf ogt, %30, %31 : vector<8x128xf32>
    %33 = math.exp %30 : vector<8x128xf32>
    %cst_20 = arith.constant 1.000000e+00 : f32
    %34 = vector.broadcast %cst_20 : f32 to vector<8x128xf32>
    %35 = arith.subf %33, %34 : vector<8x128xf32>
    %36 = arith.select %32, %30, %35 : vector<8x128xi1>, vector<8x128xf32>
    %37 = arith.truncf %36 : vector<8x128xf32> to vector<8x128xbf16>
    %c0_21 = arith.constant 0 : index
    %c0_22 = arith.constant 0 : index
    %38 = vector.load %arg8[%c0_21, %c0_22] : memref<128x128xbf16, #tpu.memory_space<vmem>>, vector<128x128xbf16>
    %cst_23 = arith.constant dense<0.000000e+00> : vector<8x128xf32>
    %39 = tpu.matmul %37, %38, %cst_23 {dimension_numbers = #tpu.dot_dimension_numbers<[1], [0], [0], [1], [0, 0, 1, 1], [], []>} : vector<8x128xbf16>, vector<128x128xbf16>, vector<8x128xf32> -> vector<8x128xf32>
    %c0_24 = arith.constant 0 : index
    %c0_25 = arith.constant 0 : index
    %40 = vector.load %arg9[%c0_24, %c0_25] : memref<1x128xf32, #tpu.memory_space<vmem>>, vector<1x128xf32>
    %41 = vector.broadcast %40 : vector<1x128xf32> to vector<8x128xf32>
    %42 = arith.addf %39, %41 : vector<8x128xf32>
    %43 = arith.truncf %42 : vector<8x128xf32> to vector<8x128xbf16>
    %c0_26 = arith.constant 0 : index
    %c0_27 = arith.constant 0 : index
    %44 = vector.load %arg10[%c0_26, %c0_27] : memref<8x128xbf16, #tpu.memory_space<vmem>>, vector<8x128xbf16>
    tpu.vector_store %arg10[%c0_26, %c0_27], %43 {strides = array<i32>} : memref<8x128xbf16, #tpu.memory_space<vmem>>, vector<8x128xbf16>,
    return
  }
  func.func @transform_0(%arg0: i32) -> (i32, i32) {
    %c0_i32 = arith.constant 0 : i32
    %c0_i32_0 = arith.constant 0 : i32
    return %arg0, %c0_i32 : i32, i32
  }
  func.func @transform_1(%arg0: i32) -> (i32, i32) {
    %c0_i32 = arith.constant 0 : i32
    %c0_i32_0 = arith.constant 0 : i32
    %c0_i32_1 = arith.constant 0 : i32
    return %c0_i32, %c0_i32_0 : i32, i32
  }
  func.func @transform_2(%arg0: i32) -> (i32, i32) {
    %c0_i32 = arith.constant 0 : i32
    %c0_i32_0 = arith.constant 0 : i32
    %c0_i32_1 = arith.constant 0 : i32
    return %c0_i32, %c0_i32_0 : i32, i32
  }
  func.func @transform_3(%arg0: i32) -> (i32, i32) {
    %c0_i32 = arith.constant 0 : i32
    %c0_i32_0 = arith.constant 0 : i32
    %c0_i32_1 = arith.constant 0 : i32
    return %c0_i32, %c0_i32_0 : i32, i32
  }
  func.func @transform_4(%arg0: i32) -> (i32, i32) {
    %c0_i32 = arith.constant 0 : i32
    %c0_i32_0 = arith.constant 0 : i32
    %c0_i32_1 = arith.constant 0 : i32
    return %c0_i32, %c0_i32_0 : i32, i32
  }
  func.func @transform_5(%arg0: i32) -> (i32, i32) {
    %c0_i32 = arith.constant 0 : i32
    %c0_i32_0 = arith.constant 0 : i32
    %c0_i32_1 = arith.constant 0 : i32
    return %c0_i32, %c0_i32_0 : i32, i32
  }
  func.func @transform_6(%arg0: i32) -> (i32, i32) {
    %c0_i32 = arith.constant 0 : i32
    %c0_i32_0 = arith.constant 0 : i32
    %c0_i32_1 = arith.constant 0 : i32
    return %c0_i32, %c0_i32_0 : i32, i32
  }
  func.func @transform_7(%arg0: i32) -> (i32, i32) {
    %c0_i32 = arith.constant 0 : i32
    %c0_i32_0 = arith.constant 0 : i32
    %c0_i32_1 = arith.constant 0 : i32
    return %c0_i32, %c0_i32_0 : i32, i32
  }
  func.func @transform_8(%arg0: i32) -> (i32, i32) {
    %c0_i32 = arith.constant 0 : i32
    %c0_i32_0 = arith.constant 0 : i32
    %c0_i32_1 = arith.constant 0 : i32
    return %c0_i32, %c0_i32_0 : i32, i32
  }
  func.func @transform_9(%arg0: i32) -> (i32, i32) {
    %c0_i32 = arith.constant 0 : i32
    %c0_i32_0 = arith.constant 0 : i32
    return %arg0, %c0_i32 : i32, i32
  }
}

module attributes {stable_mosaic.version = 11 : i64} {
  func.func @cifra_mlp_kernel(%arg0: i32, %arg1: memref<8x128xf32, #tpu.memory_space<vmem>>, %arg2: memref<128x256xbf16, #tpu.memory_space<vmem>>, %arg3: memref<1x256xf32, #tpu.memory_space<vmem>>, %arg4: memref<256x128xbf16, #tpu.memory_space<vmem>>, %arg5: memref<1x128xf32, #tpu.memory_space<vmem>>, %arg6: memref<128x128xbf16, #tpu.memory_space<vmem>>, %arg7: memref<1x128xf32, #tpu.memory_space<vmem>>, %arg8: memref<128x128xbf16, #tpu.memory_space<vmem>>, %arg9: memref<1x128xf32, #tpu.memory_space<vmem>>, %arg10: memref<8x128xbf16, #tpu.memory_space<vmem>>) attributes {dimension_semantics = [#tpu.dimension_semantics<parallel>], iteration_bounds = array<i64: 1>, scalar_prefetch = 0 : i64, scratch_operands = 0 : i64, tpu.core_type = #tpu.core_type<tc>, window_params = [{transform_indices = @transform_0, window_bounds = array<i64: 8, 128>}, {pipeline_mode = #tpu.pipeline_mode<synchronous>, transform_indices = @transform_1, window_bounds = array<i64: 128, 256>}, {pipeline_mode = #tpu.pipeline_mode<synchronous>, transform_indices = @transform_2, window_bounds = array<i64: 1, 256>}, {pipeline_mode = #tpu.pipeline_mode<synchronous>, transform_indices = @transform_3, window_bounds = array<i64: 256, 128>}, {pipeline_mode = #tpu.pipeline_mode<synchronous>, transform_indices = @transform_4, window_bounds = array<i64: 1, 128>}, {pipeline_mode = #tpu.pipeline_mode<synchronous>, transform_indices = @transform_5, window_bounds = array<i64: 128, 128>}, {pipeline_mode = #tpu.pipeline_mode<synchronous>, transform_indices = @transform_6, window_bounds = array<i64: 1, 128>}, {pipeline_mode = #tpu.pipeline_mode<synchronous>, transform_indices = @transform_7, window_bounds = array<i64: 128, 128>}, {pipeline_mode = #tpu.pipeline_mode<synchronous>, transform_indices = @transform_8, window_bounds = array<i64: 1, 128>}, {transform_indices = @transform_9, window_bounds = array<i64: 8, 128>}]} {
    %c0 = arith.constant 0 : index
    %c0_0 = arith.constant 0 : index
    %0 = vector.load %arg1[%c0, %c0_0] : memref<8x128xf32, #tpu.memory_space<vmem>>, vector<8x128xf32>
    %1 = arith.truncf %0 : vector<8x128xf32> to vector<8x128xbf16>
    %c0_1 = arith.constant 0 : index
    %c0_2 = arith.constant 0 : index
    %2 = vector.load %arg2[%c0_1, %c0_2] : memref<128x256xbf16, #tpu.memory_space<vmem>>, vector<128x256xbf16>
    %cst = arith.constant dense<0.000000e+00> : vector<8x256xf32>
    %3 = tpu.matmul %1, %2, %cst {dimension_numbers = #tpu.dot_dimension_numbers<[1], [0], [0], [1], [0, 0, 1, 1], [], []>} : vector<8x128xbf16>, vector<128x256xbf16>, vector<8x256xf32> -> vector<8x256xf32>
    %c0_3 = arith.constant 0 : index
    %c0_4 = arith.constant 0 : index
    %4 = vector.load %arg3[%c0_3, %c0_4] : memref<1x256xf32, #tpu.memory_space<vmem>>, vector<1x256xf32>
    %5 = vector.broadcast %4 : vector<1x256xf32> to vector<8x256xf32>
    %6 = arith.addf %3, %5 : vector<8x256xf32>
    %cst_5 = arith.constant 0.000000e+00 : f32
    %7 = vector.broadcast %cst_5 : f32 to vector<8x256xf32>
    %8 = arith.cmpf ogt, %6, %7 : vector<8x256xf32>
    %9 = math.exp %6 : vector<8x256xf32>
    %cst_6 = arith.constant 1.000000e+00 : f32
    %10 = vector.broadcast %cst_6 : f32 to vector<8x256xf32>
    %11 = arith.subf %9, %10 : vector<8x256xf32>
    %12 = arith.select %8, %6, %11 : vector<8x256xi1>, vector<8x256xf32>
    %13 = arith.truncf %12 : vector<8x256xf32> to vector<8x256xbf16>
    %c0_7 = arith.constant 0 : index
    %c0_8 = arith.constant 0 : index
    %14 = vector.load %arg4[%c0_7, %c0_8] : memref<256x128xbf16, #tpu.memory_space<vmem>>, vector<256x128xbf16>
    %cst_9 = arith.constant dense<0.000000e+00> : vector<8x128xf32>
    %15 = tpu.matmul %13, %14, %cst_9 {dimension_numbers = #tpu.dot_dimension_numbers<[1], [0], [0], [1], [0, 0, 1, 1], [], []>} : vector<8x256xbf16>, vector<256x128xbf16>, vector<8x128xf32> -> vector<8x128xf32>
    %c0_10 = arith.constant 0 : index
    %c0_11 = arith.constant 0 : index
    %16 = vector.load %arg5[%c0_10, %c0_11] : memref<1x128xf32, #tpu.memory_space<vmem>>, vector<1x128xf32>
    %17 = vector.broadcast %16 : vector<1x128xf32> to vector<8x128xf32>
    %18 = arith.addf %15, %17 : vector<8x128xf32>
    %cst_12 = arith.constant 0.000000e+00 : f32
    %19 = vector.broadcast %cst_12 : f32 to vector<8x128xf32>
    %20 = arith.cmpf ogt, %18, %19 : vector<8x128xf32>
    %21 = math.exp %18 : vector<8x128xf32>
    %cst_13 = arith.constant 1.000000e+00 : f32
    %22 = vector.broadcast %cst_13 : f32 to vector<8x128xf32>
    %23 = arith.subf %21, %22 : vector<8x128xf32>
    %24 = arith.select %20, %18, %23 : vector<8x128xi1>, vector<8x128xf32>
    %25 = arith.truncf %24 : vector<8x128xf32> to vector<8x128xbf16>
    %c0_14 = arith.constant 0 : index
    %c0_15 = arith.constant 0 : index
    %26 = vector.load %arg6[%c0_14, %c0_15] : memref<128x128xbf16, #tpu.memory_space<vmem>>, vector<128x128xbf16>
    %cst_16 = arith.constant dense<0.000000e+00> : vector<8x128xf32>
    %27 = tpu.matmul %25, %26, %cst_16 {dimension_numbers = #tpu.dot_dimension_numbers<[1], [0], [0], [1], [0, 0, 1, 1], [], []>} : vector<8x128xbf16>, vector<128x128xbf16>, vector<8x128xf32> -> vector<8x128xf32>
    %c0_17 = arith.constant 0 : index
    %c0_18 = arith.constant 0 : index
    %28 = vector.load %arg7[%c0_17, %c0_18] : memref<1x128xf32, #tpu.memory_space<vmem>>, vector<1x128xf32>
    %29 = vector.broadcast %28 : vector<1x128xf32> to vector<8x128xf32>
    %30 = arith.addf %27, %29 : vector<8x128xf32>
    %cst_19 = arith.constant 0.000000e+00 : f32
    %31 = vector.broadcast %cst_19 : f32 to vector<8x128xf32>
    %32 = arith.cmpf ogt, %30, %31 : vector<8x128xf32>
    %33 = math.exp %30 : vector<8x128xf32>
    %cst_20 = arith.constant 1.000000e+00 : f32
    %34 = vector.broadcast %cst_20 : f32 to vector<8x128xf32>
    %35 = arith.subf %33, %34 : vector<8x128xf32>
    %36 = arith.select %32, %30, %35 : vector<8x128xi1>, vector<8x128xf32>
    %37 = arith.truncf %36 : vector<8x128xf32> to vector<8x128xbf16>
    %c0_21 = arith.constant 0 : index
    %c0_22 = arith.constant 0 : index
    %38 = vector.load %arg8[%c0_21, %c0_22] : memref<128x128xbf16, #tpu.memory_space<vmem>>, vector<128x128xbf16>
    %cst_23 = arith.constant dense<0.000000e+00> : vector<8x128xf32>
    %39 = tpu.matmul %37, %38, %cst_23 {dimension_numbers = #tpu.dot_dimension_numbers<[1], [0], [0], [1], [0, 0, 1, 1], [], []>} : vector<8x128xbf16>, vector<128x128xbf16>, vector<8x128xf32> -> vector<8x128xf32>
    %c0_24 = arith.constant 0 : index
    %c0_25 = arith.constant 0 : index
    %40 = vector.load %arg9[%c0_24, %c0_25] : memref<1x128xf32, #tpu.memory_space<vmem>>, vector<1x128xf32>
    %41 = vector.broadcast %40 : vector<1x128xf32> to vector<8x128xf32>
    %42 = arith.addf %39, %41 : vector<8x128xf32>
    %43 = arith.truncf %42 : vector<8x128xf32> to vector<8x128xbf16>
    %c0_26 = arith.constant 0 : index
    %c0_27 = arith.constant 0 : index
    %44 = vector.load %arg10[%c0_26, %c0_27] : memref<8x128xbf16, #tpu.memory_space<vmem>>, vector<8x128xbf16>
    tpu.vector_store %arg10[%c0_26, %c0_27], %43 {strides = array<i32>} : memref<8x128xbf16, #tpu.memory_space<vmem>>, vector<8x128xbf16>,
    return
  }
  func.func @transform_0(%arg0: i32) -> (i32, i32) {
    %c0_i32 = arith.constant 0 : i32
    %c0_i32_0 = arith.constant 0 : i32
    return %arg0, %c0_i32 : i32, i32
  }
  func.func @transform_1(%arg0: i32) -> (i32, i32) {
    %c0_i32 = arith.constant 0 : i32
    %c0_i32_0 = arith.constant 0 : i32
    %c0_i32_1 = arith.constant 0 : i32
    return %c0_i32, %c0_i32_0 : i32, i32
  }
  func.func @transform_2(%arg0: i32) -> (i32, i32) {
    %c0_i32 = arith.constant 0 : i32
    %c0_i32_0 = arith.constant 0 : i32
    %c0_i32_1 = arith.constant 0 : i32
    return %c0_i32, %c0_i32_0 : i32, i32
  }
  func.func @transform_3(%arg0: i32) -> (i32, i32) {
    %c0_i32 = arith.constant 0 : i32
    %c0_i32_0 = arith.constant 0 : i32
    %c0_i32_1 = arith.constant 0 : i32
    return %c0_i32, %c0_i32_0 : i32, i32
  }
  func.func @transform_4(%arg0: i32) -> (i32, i32) {
    %c0_i32 = arith.constant 0 : i32
    %c0_i32_0 = arith.constant 0 : i32
    %c0_i32_1 = arith.constant 0 : i32
    return %c0_i32, %c0_i32_0 : i32, i32
  }
  func.func @transform_5(%arg0: i32) -> (i32, i32) {
    %c0_i32 = arith.constant 0 : i32
    %c0_i32_0 = arith.constant 0 : i32
    %c0_i32_1 = arith.constant 0 : i32
    return %c0_i32, %c0_i32_0 : i32, i32
  }
  func.func @transform_6(%arg0: i32) -> (i32, i32) {
    %c0_i32 = arith.constant 0 : i32
    %c0_i32_0 = arith.constant 0 : i32
    %c0_i32_1 = arith.constant 0 : i32
    return %c0_i32, %c0_i32_0 : i32, i32
  }
  func.func @transform_7(%arg0: i32) -> (i32, i32) {
    %c0_i32 = arith.constant 0 : i32
    %c0_i32_0 = arith.constant 0 : i32
    %c0_i32_1 = arith.constant 0 : i32
    return %c0_i32, %c0_i32_0 : i32, i32
  }
  func.func @transform_8(%arg0: i32) -> (i32, i32) {
    %c0_i32 = arith.constant 0 : i32
    %c0_i32_0 = arith.constant 0 : i32
    %c0_i32_1 = arith.constant 0 : i32
    return %c0_i32, %c0_i32_0 : i32, i32
  }
  func.func @transform_9(%arg0: i32) -> (i32, i32) {
    %c0_i32 = arith.constant 0 : i32
    %c0_i32_0 = arith.constant 0 : i32
    return %arg0, %c0_i32 : i32, i32
  }
}

</mosaic_0001>

<bundles_post_ra>
// kernel: tpu_custom_call.1
= control target key start
LH: loop header
LB: loop body
LE: loop exit
PB: predicated region body
PF: predicated region fallthrough
CT: control target
= control target key end

     0   :  { %14 = vsyncpa [#allocation3], 0  ;;  %s1217_s0 = inlined_call_operand.hbm [shape: f32[8,128], index: 0, kind: input, shape index: {}]   ;;  %s1218_s1 = inlined_call_operand.hbm [shape: bf16[128,256], index: 1, kind: input, shape index: {}]   ;;  %s1219_s2 = inlined_call_operand.vmem [shape: f32[1,256], index: 2, kind: input, shape index: {}]   ;;  %s1220_s3 = inlined_call_operand.hbm [shape: bf16[256,128], index: 3, kind: input, shape index: {}]   ;;  %s1221_s4 = inlined_call_operand.vmem [shape: f32[1,128], index: 4, kind: input, shape index: {}]   ;;  %s1222_s5 = inlined_call_operand.hbm [shape: bf16[128,128], index: 5, kind: input, shape index: {}]   ;;  %s1223_s6 = inlined_call_operand.vmem [shape: f32[1,128], index: 6, kind: input, shape index: {}]   ;;  %s1224_s7 = inlined_call_operand.hbm [shape: bf16[128,128], index: 7, kind: input, shape index: {}]   ;;  %s1225_s8 = inlined_call_operand.vmem [shape: f32[1,128], index: 8, kind: input, shape index: {}]   ;;  %s1226_s9 = inlined_call_operand.hbm [shape: bf16[8,128], index: 9, kind: output, shape index: {}]  }
   0x1   :  { %15 = vsyncpa [#allocation6], 0 }
   0x2   :  { %16 = vsyncpa [#allocation9], 0 }
   0x3   :  { %17 = vsyncpa [#allocation4], 0  ;;  %s1043_s30 = smov [#allocation5]   ;;  %s903_s13 = scalar_lea.hbm %s1218_s1, 2048 }
   0x4   :  { %s33_s10 = sshll.u32 %s1043_s30, 4  ;;  %p904_p0 = scmp.ne.s32.totalorder %s1218_s1, %s903_s13  ;;  %s34_s10 = int_to_ptr.vmem [resolvable:$true] %s33_s10 }
   0x5   :  { %p907_p1 = scmp.lt.u32.totalorder %s903_s13, %s1218_s1 }
   0x7   :  { %p909_p2 = pnand %p907_p1, %p904_p0 }
   0x9   :  { %912 = shalt.err (!%p909_p2)
}
   0xa   :  { %s913_s18 = scalar_lea.vmem %s34_s10, 2048  ;;  %p918_p4 = scmp.lt.s32.totalorder %s34_s10, %s34_s10 }
   0xb   :  { %p914_p3 = scmp.ne.s32.totalorder %s34_s10, %s913_s18  ;;  %p919_p5 = scmp.lt.s32.totalorder %s913_s18, %s913_s18 }
   0xd   :  { %p920_p6 = por %p919_p5, %p918_p4 }
   0xf   :  { %p921_p7 = pnand %p920_p6, %p914_p3 }
  0x11   :  { %924 = shalt.err (!%p921_p7)
}
  0x12   :  { %s1044_s19 = smov 128   ;;  %s1045_s20 = smov 8  }
  0x13   :  { %39 = dma.hbm_to_vmem [thread:$0]  %s1218_s1, 2048, %s34_s10, [#allocation6], %s1044_s19, %s1044_s19, %s1045_s20  }
  0x14   :  { %s1046_s23 = smov [#allocation8]   ;;  %s1047_s25 = smov [#allocation2]  }
  0x15   :  { %s61_s24 = sshll.u32 %s1046_s23, 4  ;;  %s24_s26 = sshll.u32 %s1047_s25, 4  ;;  %s62_s24 = int_to_ptr.vmem [resolvable:$true] %s61_s24  ;;  %s25_s26 = int_to_ptr.vmem [resolvable:$true] %s24_s26 }
  0x16   :  { %s925_s29 = scalar_lea.hbm %s1222_s5, 1024 }
  0x17   :  { %p926_p8 = scmp.ne.s32.totalorder %s1222_s5, %s925_s29  ;;  %p929_p9 = scmp.lt.u32.totalorder %s925_s29, %s1222_s5 }
  0x19   :  { %p931_p10 = pnand %p929_p9, %p926_p8 }
  0x1b   :  { %934 = shalt.err (!%p931_p10)
}
  0x1c   :  { %s935_s1 = scalar_lea.vmem %s62_s24, 1024  ;;  %p940_p12 = scmp.lt.s32.totalorder %s62_s24, %s62_s24 }
  0x1d   :  { %p936_p11 = scmp.ne.s32.totalorder %s62_s24, %s935_s1  ;;  %p941_p13 = scmp.lt.s32.totalorder %s935_s1, %s935_s1 }
  0x1f   :  { %p942_p0 = por %p941_p13, %p940_p12 }
  0x21   :  { %p943_p1 = pnand %p942_p0, %p936_p11 }
  0x23   :  { %946 = shalt.err (!%p943_p1)
}
  0x24   :  { %s1048_s10 = smov 64   ;;  %s1049_s14 = smov 4  }
  0x25   :  { %67 = dma.hbm_to_vmem [thread:$0]  %s1222_s5, 1024, %s62_s24, [#allocation9], %s1048_s10, %s1048_s10, %s1049_s14  }
  0x26   :  { %s947_s19 = scalar_lea.hbm %s1217_s0, 128 }
  0x27   :  { %p948_p2 = scmp.ne.s32.totalorder %s1217_s0, %s947_s19  ;;  %p951_p3 = scmp.lt.u32.totalorder %s947_s19, %s1217_s0 }
  0x29   :  { %p953_p4 = pnand %p951_p3, %p948_p2 }
  0x2b   :  { %956 = shalt.err (!%p953_p4)
}
  0x2c   :  { %s957_s25 = scalar_lea.vmem %s25_s26, 128  ;;  %p962_p6 = scmp.lt.s32.totalorder %s25_s26, %s25_s26 }
  0x2d   :  { %p958_p5 = scmp.ne.s32.totalorder %s25_s26, %s957_s25  ;;  %p963_p7 = scmp.lt.s32.totalorder %s957_s25, %s957_s25 }
  0x2f   :  { %p964_p8 = por %p963_p7, %p962_p6 }
  0x31   :  { %p965_p9 = pnand %p964_p8, %p958_p5 }
  0x33   :  { %968 = shalt.err (!%p965_p9)
}
  0x34   :  { %27 = dma.hbm_to_vmem [thread:$0]  %s1217_s0, 128, %s25_s26, [#allocation3]  }
  0x35   :  { %s1050_s27 = smov [#allocation7]   ;;  %s1051_s29 = smov [#allocation10]  }
  0x36   :  { %s47_s28 = sshll.u32 %s1050_s27, 4  ;;  %s75_s30 = sshll.u32 %s1051_s29, 4  ;;  %s48_s28 = int_to_ptr.vmem [resolvable:$true] %s47_s28  ;;  %s76_s30 = int_to_ptr.vmem [resolvable:$true] %s75_s30 }
  0x37   :  { %s969_s13 = scalar_lea.hbm %s1220_s3, 2048 }
  0x38   :  { %p970_p10 = scmp.ne.s32.totalorder %s1220_s3, %s969_s13  ;;  %p973_p11 = scmp.lt.u32.totalorder %s969_s13, %s1220_s3 }
  0x3a   :  { %p975_p12 = pnand %p973_p11, %p970_p10 }
  0x3c   :  { %978 = shalt.err (!%p975_p12)
}
  0x3d   :  { %s979_s0 = scalar_lea.vmem %s48_s28, 2048  ;;  %p984_p0 = scmp.lt.s32.totalorder %s48_s28, %s48_s28 }
  0x3e   :  { %p980_p13 = scmp.ne.s32.totalorder %s48_s28, %s979_s0  ;;  %p985_p1 = scmp.lt.s32.totalorder %s979_s0, %s979_s0 }
  0x40   :  { %p986_p2 = por %p985_p1, %p984_p0 }
  0x42   :  { %p987_p3 = pnand %p986_p2, %p980_p13 }
  0x44   :  { %990 = shalt.err (!%p987_p3)
}
  0x45   :  { %53 = dma.hbm_to_vmem [thread:$0]  %s1220_s3, 2048, %s48_s28, [#allocation6], %s1048_s10, %s1048_s10, %s1049_s14  }
  0x46   :  { %s991_s21 = scalar_lea.hbm %s1224_s7, 1024 }
  0x47   :  { %p992_p4 = scmp.ne.s32.totalorder %s1224_s7, %s991_s21  ;;  %p995_p5 = scmp.lt.u32.totalorder %s991_s21, %s1224_s7 }
  0x49   :  { %p997_p6 = pnand %p995_p5, %p992_p4 }
  0x4b   :  { %1000 = shalt.err (!%p997_p6)
}
  0x4c   :  { %s1001_s24 = scalar_lea.vmem %s76_s30, 1024  ;;  %p1006_p8 = scmp.lt.s32.totalorder %s76_s30, %s76_s30 }
  0x4d   :  { %p1002_p7 = scmp.ne.s32.totalorder %s76_s30, %s1001_s24  ;;  %p1007_p9 = scmp.lt.s32.totalorder %s1001_s24, %s1001_s24 }
  0x4f   :  { %p1008_p10 = por %p1007_p9, %p1006_p8 }
  0x51   :  { %p1009_p11 = pnand %p1008_p10, %p1002_p7 }
  0x53   :  { %1012 = shalt.err (!%p1009_p11)
}
  0x54   :  { %81 = dma.hbm_to_vmem [thread:$0]  %s1224_s7, 1024, %s76_s30, [#allocation9], %s1048_s10, %s1048_s10, %s1049_s14  }
  0x55   :  { %1035 = dma.done.wait [#allocation3], 128  }
  0x56   :  { %1036 = vsyncadd [#allocation3], 4294967168 }
  0x57   :  { %1037 = dma.done.wait [#allocation6], 4096  }
  0x58   :  { %1038 = vsyncadd [#allocation6], 4294963200 }
  0x59   :  { %1039 = dma.done.wait [#allocation9], 2048  }
  0x5a   :  { %1040 = vsyncadd [#allocation9], 4294965248  ;;  %v1052_v0 = vmov 0   ;;  %v839_v1 = vld [vmem:[#allocation5 + $0x4] ss:$8 sps:$4 sm:$0xff]   ;;  %v867_v15 = vld [vmem:[#allocation7 + $0x50] sm:$0xff]   ;;  %v120_v38 = vlaneseq }
  0x5b   :  { %242 = vmatprep.mubr.bf16.mxu0 %v1052_v0  ;;  %v841_v2 = vld [vmem:[#allocation5] ss:$8 sps:$4 sm:$0xff]   ;;  %210 = vmatprep.subr.bf16.mxu0 %v839_v1  ;;  %v842_v3 = vld [vmem:[#allocation5 + $0x14] ss:$8 sps:$4 sm:$0xff]   ;;  %v844_v4 = vld [vmem:[#allocation5 + $0x10] ss:$8 sps:$4 sm:$0xff]  }
  0x5c   :  { %211 = vmatpush1.bf16.msra.mxu0 %v841_v2  ;;  %v845_v5 = vld [vmem:[#allocation5 + $0x24] ss:$8 sps:$4 sm:$0xff]   ;;  %v847_v6 = vld [vmem:[#allocation5 + $0x20] ss:$8 sps:$4 sm:$0xff]   ;;  %v848_v7 = vld [vmem:[#allocation5 + $0x34] ss:$8 sps:$4 sm:$0xff]  }
  0x5d   :  { %212 = vmatprep.subr.bf16.mxu0 %v842_v3  ;;  %v850_v8 = vld [vmem:[#allocation5 + $0x30] ss:$8 sps:$4 sm:$0xff]   ;;  %v851_v9 = vld [vmem:[#allocation5 + $0x44] ss:$8 sps:$4 sm:$0xff]   ;;  %v853_v12 = vld [vmem:[#allocation5 + $0x40] ss:$8 sps:$4 sm:$0xff]  }
  0x5e   :  { %v863_v10 = vld [vmem:[#allocation7 + $0x40] sm:$0xff]   ;;  %v865_v13 = vld [vmem:[#allocation7 + $0x48] sm:$0xff]   ;;  %v854_v16 = vld [vmem:[#allocation5 + $0x54] ss:$8 sps:$4 sm:$0xff]   ;;  %v1053_v36 = vmov 0.0   ;;  %v121_v39 = vshrl.u32 %v120_v38, 7 }
  0x5f   :  { %v864_v11 = vld [vmem:[#allocation7] sm:$0xff]   ;;  %746 = vmatprep.subr.bf16.mxu1 %v863_v10  ;;  %v866_v14 = vld [vmem:[#allocation7 + $0x8] sm:$0xff]   ;;  %v856_v17 = vld [vmem:[#allocation5 + $0x50] ss:$8 sps:$4 sm:$0xff]   ;;  %vm1054_vm2 = vmmov 0   ;;  %s1055_s11 = smov [#allocation11]  }
  0x60   :  { %213 = vmatpush1.bf16.msra.mxu0 %v844_v4  ;;  %747 = vmatpush3.bf16.msra.mxu1 %v864_v11  ;;  %v857_v18 = vld [vmem:[#allocation5 + $0x64] ss:$8 sps:$4 sm:$0xff]   ;;  %v859_v19 = vld [vmem:[#allocation5 + $0x60] ss:$8 sps:$4 sm:$0xff]   ;;  %v860_v20 = vld [vmem:[#allocation5 + $0x74] ss:$8 sps:$4 sm:$0xff]  }
  0x61   :  { %214 = vmatprep.subr.bf16.mxu0 %v845_v5  ;;  %748 = vmatprep.subr.bf16.mxu1 %v865_v13  ;;  %v862_v21 = vld [vmem:[#allocation5 + $0x70] ss:$8 sps:$4 sm:$0xff]   ;;  %v871_v27 = vld [vmem:[#allocation7 + $0x60] sm:$0xff]   ;;  %v873_v29 = vld [vmem:[#allocation7 + $0x68] sm:$0xff]   ;;  %v122_v40 = vsub.s32 0, %v121_v39  ;;  %v126_v42 = vsub.s32 1, %v121_v39 }
  0x62   :  { %v100_v22 = vld [vmem:[#allocation2] sm:$0xff]  ;;  %v868_v24 = vld [vmem:[#allocation7 + $0x10] sm:$0xff]   ;;  %v872_v28 = vld [vmem:[#allocation7 + $0x20] sm:$0xff]  }
  0x63   :  { %v101_v23 = vpack.c.bf16 %v100_v22, %v100_v22  ;;  %v869_v25 = vld [vmem:[#allocation7 + $0x58] sm:$0xff]   ;;  %v874_v30 = vld [vmem:[#allocation7 + $0x28] sm:$0xff]   ;;  %v875_v31 = vld [vmem:[#allocation7 + $0x70] sm:$0xff]  }
  0x64   :  { %215 = vmatpush1.bf16.msra.mxu0 %v847_v6  ;;  %749 = vmatpush3.bf16.msra.mxu1 %v866_v14  ;;  %v870_v26 = vld [vmem:[#allocation7 + $0x18] sm:$0xff]   ;;  %v876_v32 = vld [vmem:[#allocation7 + $0x30] sm:$0xff]   ;;  %v879_v35 = vld [vmem:[#allocation8] sm:$0xff]  }
  0x65   :  { %216 = vmatprep.subr.bf16.mxu0 %v848_v7  ;;  %750 = vmatprep.subr.bf16.mxu1 %v867_v15  ;;  %v877_v33 = vld [vmem:[#allocation7 + $0x78] sm:$0xff]   ;;  %v880_v37 = vld [vmem:[#allocation8 + $0x8] sm:$0xff]   ;;  %v881_v61 = vld [vmem:[#allocation8 + $0x10] sm:$0xff]  }
  0x66   :  { %v878_v34 = vld [vmem:[#allocation7 + $0x38] sm:$0xff]   ;;  %v883_v63 = vld [vmem:[#allocation8 + $0x20] sm:$0xff]   ;;  %v884_v0 = vld [vmem:[#allocation8 + $0x28] sm:$0xff]  }
  0x67   :  { %v118_v41 = vld [vmem:[%s1219_s2] sm:$0x3]  ;;  %v885_v1 = vld [vmem:[#allocation8 + $0x30] sm:$0xff]   ;;  %v887_v3 = vld [vmem:[#allocation10] sm:$0xff]  }
  0x68   :  { %217 = vmatpush1.bf16.msra.mxu0 %v850_v8  ;;  %751 = vmatpush3.bf16.msra.mxu1 %v868_v24  ;;  %v123_v43 = vrot.slane %v118_v41, %v122_v40  ;;  %v127_v44 = vrot.slane %v118_v41, %v126_v42  ;;  %v882_v62 = vld [vmem:[#allocation8 + $0x18] sm:$0xff]   ;;  %v888_v4 = vld [vmem:[#allocation10 + $0x8] sm:$0xff]   ;;  %v889_v5 = vld [vmem:[#allocation10 + $0x10] sm:$0xff]  }
  0x69   :  { %218 = vmatprep.subr.bf16.mxu0 %v851_v9  ;;  %752 = vmatprep.subr.bf16.mxu1 %v869_v25  ;;  %v886_v2 = vld [vmem:[#allocation8 + $0x38] sm:$0xff]  }
  0x6a   :  { %v709_v7 = vld [vmem:[%s1221_s4] ss:$0 sm:$0xff] }
  0x6b   :  { %v894_v22 = vld [vmem:[#allocation10 + $0x38] sm:$0xff]  }
  0x6c   :  { %219 = vmatpush1.bf16.msra.mxu0 %v853_v12  ;;  %753 = vmatpush3.bf16.msra.mxu1 %v870_v26 }
  0x6d   :  { %220 = vmatprep.subr.bf16.mxu0 %v854_v16  ;;  %754 = vmatprep.subr.bf16.mxu1 %v871_v27 }
  0x70   :  { %221 = vmatpush1.bf16.msra.mxu0 %v856_v17  ;;  %755 = vmatpush3.bf16.msra.mxu1 %v872_v28 }
  0x71   :  { %222 = vmatprep.subr.bf16.mxu0 %v857_v18  ;;  %756 = vmatprep.subr.bf16.mxu1 %v873_v29  ;;  %v890_v18 = vld [vmem:[#allocation10 + $0x18] sm:$0xff]  }
  0x74   :  { %223 = vmatpush1.bf16.msra.mxu0 %v859_v19  ;;  %757 = vmatpush3.bf16.msra.mxu1 %v874_v30  ;;  %v891_v19 = vld [vmem:[#allocation10 + $0x20] sm:$0xff]  }
  0x75   :  { %224 = vmatprep.subr.bf16.mxu0 %v860_v20  ;;  %758 = vmatprep.subr.bf16.mxu1 %v875_v31  ;;  %v892_v20 = vld [vmem:[#allocation10 + $0x28] sm:$0xff]  }
  0x78   :  { %225 = vmatpush1.bf16.msra.mxu0 %v862_v21  ;;  %759 = vmatpush3.bf16.msra.mxu1 %v876_v32  ;;  %v893_v21 = vld [vmem:[#allocation10 + $0x30] sm:$0xff]  }
  0x79   :  { %760 = vmatprep.subr.bf16.mxu1 %v877_v33  ;;  %786 = vmatprep.subr.bf16.mxu0 %v1053_v36 }
  0x7b   :  { %243 = vmatmul.mubr.bf16.vlgmr.msra.gmra.mrb[0].mxu0 %v101_v23  ;;  %v727_v23 = vld [vmem:[%s1223_s6] ss:$0 sm:$0xff]  ;;  %s680_s6 = sshll.u32 %s1055_s11, 4  ;;  %s681_s6 = int_to_ptr.vmem [resolvable:$true] %s680_s6 }
  0x7c   :  { %761 = vmatpush3.bf16.msra.mxu1 %v878_v34  ;;  %787 = vmatpush3.bf16.msra.mxu0 %v879_v35  ;;  %v737_v34 = vld [vmem:[%s1225_s8] ss:$0 sm:$0xff]  ;;  %s1013_s12 = scalar_lea.vmem %s681_s6, 64  ;;  %p1018_p13 = scmp.lt.s32.totalorder %s681_s6, %s681_s6 }
  0x7d   :  { %806 = vmatprep.subr.bf16.mxu1 %v1053_v36  ;;  %788 = vmatprep.subr.bf16.mxu0 %v1053_v36  ;;  %p1014_p12 = scmp.ne.s32.totalorder %s681_s6, %s1013_s12  ;;  %p1019_p0 = scmp.lt.s32.totalorder %s1013_s12, %s1013_s12 }
  0x7e   :  { %802 = vmatprep.mubr.msk.bf16.mxu0 %vm1054_vm2, %v1053_v36 }
  0x7f   :  { %p1020_p1 = por %p1019_p0, %p1018_p13 }
  0x80   :  { %789 = vmatpush3.bf16.msra.mxu0 %v880_v37 }
  0x81   :  { %790 = vmatprep.subr.bf16.mxu0 %v1053_v36  ;;  %p1021_p2 = pnand %p1020_p1, %p1014_p12 }
  0x84   :  { %791 = vmatpush3.bf16.msra.mxu0 %v881_v61 }
  0x85   :  { %792 = vmatprep.subr.bf16.mxu0 %v1053_v36 }
  0x88   :  { %793 = vmatpush3.bf16.msra.mxu0 %v882_v62 }
  0x89   :  { %794 = vmatprep.subr.bf16.mxu0 %v1053_v36 }
  0x8c   :  { %795 = vmatpush3.bf16.msra.mxu0 %v883_v63 }
  0x8d   :  { %796 = vmatprep.subr.bf16.mxu0 %v1053_v36 }
  0x90   :  { %797 = vmatpush3.bf16.msra.mxu0 %v884_v0 }
  0x91   :  { %798 = vmatprep.subr.bf16.mxu0 %v1053_v36 }
  0x94   :  { %799 = vmatpush3.bf16.msra.mxu0 %v885_v1 }
  0x95   :  { %800 = vmatprep.subr.bf16.mxu0 %v1053_v36 }
  0x98   :  { %801 = vmatpush3.bf16.msra.mxu0 %v886_v2 }
 0x14e   :  { %v244_v45 = vpop.f32.mrb[0].mxu0 }
 0x14f   :  { %v245_v46 = vadd.f32 %v244_v45, %v123_v43  ;;  %v246_v47 = vpop.f32.mrb[1].mxu0 }
 0x150   :  { %v247_v48 = vadd.f32 %v246_v47, %v127_v44  ;;  %v248_v49 = vpop.f32.mrb[2].mxu0 }
 0x151   :  { %v253_v50 = vmul.f32 1.442695, %v245_v46  ;;  %v249_v51 = vpop.f32.mrb[3].mxu0  ;;  %vm251_vm0 = vcmp.gt.f32.partialorder %v245_v46, 0.0 }
 0x152   :  { %v255_v52 = vmul.f32 1.442695, %v247_v48  ;;  %vm252_vm1 = vcmp.gt.f32.partialorder %v247_v48, 0.0 }
 0x153   :  { %895 = vpow2.f32 %v253_v50 }
 0x154   :  { %897 = vpow2.f32 %v255_v52 }
 0x15d   :  { %v896_v53 = vpop.eup %895 }
 0x15e   :  { %v898_v54 = vpop.eup %897  ;;  %v707_v55 = vadd.f32 -1.0, %v896_v53 }
 0x15f   :  { %v708_v56 = vadd.f32 -1.0, %v898_v54 }
 0x160   :  { %v259_v57 = vsel %vm251_vm0, %v245_v46, %v707_v55 }
 0x161   :  { %v260_v58 = vsel %vm252_vm1, %v247_v48, %v708_v56  ;;  %v261_v60 = vpack.c.bf16 %v259_v57, %v259_v57 }
 0x162   :  { %v262_v59 = vpack.c.bf16 %v260_v58, %v260_v58 }
 0x164   :  { %430 = vmatprep.mubr.bf16.mxu1 %v262_v59 }
 0x165   :  { %431 = vmatmul.mubr.bf16.vlgmr.msra.gmra.mrb[0].mxu1 %v261_v60 }
 0x166   :  { %822 = vmatprep.mubr.msk.bf16.mxu1 %vm1054_vm2, %v1053_v36  ;;  %807 = vmatpush3.bf16.msra.mxu1 %v887_v3 }
 0x167   :  { %808 = vmatprep.subr.bf16.mxu1 %v1053_v36 }
 0x16a   :  { %809 = vmatpush3.bf16.msra.mxu1 %v888_v4 }
 0x16b   :  { %810 = vmatprep.subr.bf16.mxu1 %v1053_v36 }
 0x16e   :  { %811 = vmatpush3.bf16.msra.mxu1 %v889_v5 }
 0x16f   :  { %812 = vmatprep.subr.bf16.mxu1 %v1053_v36 }
 0x172   :  { %813 = vmatpush3.bf16.msra.mxu1 %v890_v18 }
 0x173   :  { %814 = vmatprep.subr.bf16.mxu1 %v1053_v36 }
 0x176   :  { %815 = vmatpush3.bf16.msra.mxu1 %v891_v19 }
 0x177   :  { %816 = vmatprep.subr.bf16.mxu1 %v1053_v36 }
 0x17a   :  { %817 = vmatpush3.bf16.msra.mxu1 %v892_v20 }
 0x17b   :  { %818 = vmatprep.subr.bf16.mxu1 %v1053_v36 }
 0x17e   :  { %819 = vmatpush3.bf16.msra.mxu1 %v893_v21 }
 0x17f   :  { %820 = vmatprep.subr.bf16.mxu1 %v1053_v36 }
 0x182   :  { %821 = vmatpush3.bf16.msra.mxu1 %v894_v22 }
 0x238   :  { %v762_v6 = vpop.f32.mrb[0].mxu1 }
 0x239   :  { %v763_v8 = vpop.f32.mrb[1].mxu1 }
 0x23a   :  { %v764_v9 = vadd.f32 %v763_v8, %v762_v6  ;;  %v765_v10 = vpop.f32.mrb[2].mxu1 }
 0x23b   :  { %v766_v11 = vpop.f32.mrb[3].mxu1 }
 0x23c   :  { %v433_v12 = vadd.f32 %v764_v9, %v709_v7 }
 0x23e   :  { %v439_v13 = vmul.f32 1.442695, %v433_v12  ;;  %vm438_vm3 = vcmp.gt.f32.partialorder %v433_v12, 0.0 }
 0x240   :  { %899 = vpow2.f32 %v439_v13 }
 0x24a   :  { %v900_v14 = vpop.eup %899 }
 0x24b   :  { %v726_v15 = vadd.f32 -1.0, %v900_v14 }
 0x24d   :  { %v442_v16 = vsel %vm438_vm3, %v433_v12, %v726_v15 }
 0x24e   :  { %v443_v17 = vpack.c.bf16 %v442_v16, %v442_v16 }
 0x250   :  { %803 = vmatmul.mubr.bf16.vlgmr.msra.gmra.mrb[4].mxu0 %v443_v17 }
 0x323   :  { %v549_v24 = vpop.f32.mrb[4].mxu0 }
 0x324   :  { %v550_v25 = vadd.f32 %v727_v23, %v549_v24  ;;  %v804_v26 = vpop.f32.mrb[5].mxu0 }
 0x325   :  { %v552_v27 = vpop.f32.mrb[6].mxu0 }
 0x326   :  { %v556_v28 = vmul.f32 1.442695, %v550_v25  ;;  %v805_v29 = vpop.f32.mrb[7].mxu0  ;;  %vm555_vm4 = vcmp.gt.f32.partialorder %v550_v25, 0.0 }
 0x328   :  { %901 = vpow2.f32 %v556_v28 }
 0x332   :  { %v902_v30 = vpop.eup %901 }
 0x333   :  { %v736_v31 = vadd.f32 -1.0, %v902_v30 }
 0x335   :  { %v559_v32 = vsel %vm555_vm4, %v550_v25, %v736_v31 }
 0x336   :  { %v560_v33 = vpack.c.bf16 %v559_v32, %v559_v32 }
 0x338   :  { %823 = vmatmul.mubr.bf16.vlgmr.msra.gmra.mrb[4].mxu1 %v560_v33 }
 0x40b   :  { %v666_v35 = vpop.f32.mrb[4].mxu1 }
 0x40c   :  { %v667_v36 = vadd.f32 %v737_v34, %v666_v35  ;;  %v824_v37 = vpop.f32.mrb[5].mxu1 }
 0x40d   :  { %v669_v38 = vpop.f32.mrb[6].mxu1 }
 0x40e   :  { %v672_v39 = vpack.c.bf16 %v667_v36, %v667_v36  ;;  %v825_v40 = vpop.f32.mrb[7].mxu1 }
 0x410   :  { %673 = vst [vmem:[#allocation11] sm:$0xf] %v672_v39 }
 0x411   :  { %1024 = shalt.err (!%p1021_p2)
}
 0x412   :  { %s1025_s8 = scalar_lea.hbm %s1226_s9, 64 }
 0x413   :  { %p1026_p3 = scmp.ne.s32.totalorder %s1226_s9, %s1025_s8  ;;  %p1029_p4 = scmp.lt.u32.totalorder %s1025_s8, %s1226_s9 }
 0x415   :  { %p1031_p5 = pnand %p1029_p4, %p1026_p3 }
 0x417   :  { %1034 = shalt.err (!%p1031_p5)
}
 0x418   :  { %683 = dma.vmem_to_hbm [thread:$0]  %s681_s6, 64, %s1226_s9, [#allocation4]  }
 0x419   :  { %1041 = dma.done.wait [#allocation4], 64  }
 0x41a   :  { %1042 = vsyncadd [#allocation4], 4294967232 }
 0x41b   :  { %687 = vsyncpa [#allocation3], 1 }
 0x41c   :  { %688 = vsyncpa [#allocation6], 1 }
 0x41d   :  { %689 = vsyncpa [#allocation9], 1 }
 0x41e   :  { %690 = vsyncpa [#allocation4], 1 }

// kernel: tpu_custom_call.1
= control target key start
LH: loop header
LB: loop body
LE: loop exit
PB: predicated region body
PF: predicated region fallthrough
CT: control target
= control target key end

     0   :  { %14 = vsyncpa [#allocation3], 0  ;;  %s1217_s0 = inlined_call_operand.hbm [shape: f32[8,128], index: 0, kind: input, shape index: {}]   ;;  %s1218_s1 = inlined_call_operand.hbm [shape: bf16[128,256], index: 1, kind: input, shape index: {}]   ;;  %s1219_s2 = inlined_call_operand.vmem [shape: f32[1,256], index: 2, kind: input, shape index: {}]   ;;  %s1220_s3 = inlined_call_operand.hbm [shape: bf16[256,128], index: 3, kind: input, shape index: {}]   ;;  %s1221_s4 = inlined_call_operand.vmem [shape: f32[1,128], index: 4, kind: input, shape index: {}]   ;;  %s1222_s5 = inlined_call_operand.hbm [shape: bf16[128,128], index: 5, kind: input, shape index: {}]   ;;  %s1223_s6 = inlined_call_operand.vmem [shape: f32[1,128], index: 6, kind: input, shape index: {}]   ;;  %s1224_s7 = inlined_call_operand.hbm [shape: bf16[128,128], index: 7, kind: input, shape index: {}]   ;;  %s1225_s8 = inlined_call_operand.vmem [shape: f32[1,128], index: 8, kind: input, shape index: {}]   ;;  %s1226_s9 = inlined_call_operand.hbm [shape: bf16[8,128], index: 9, kind: output, shape index: {}]  }
   0x1   :  { %15 = vsyncpa [#allocation6], 0 }
   0x2   :  { %16 = vsyncpa [#allocation9], 0 }
   0x3   :  { %17 = vsyncpa [#allocation4], 0  ;;  %s1043_s30 = smov [#allocation5]   ;;  %s903_s13 = scalar_lea.hbm %s1218_s1, 2048 }
   0x4   :  { %s33_s10 = sshll.u32 %s1043_s30, 4  ;;  %p904_p0 = scmp.ne.s32.totalorder %s1218_s1, %s903_s13  ;;  %s34_s10 = int_to_ptr.vmem [resolvable:$true] %s33_s10 }
   0x5   :  { %p907_p1 = scmp.lt.u32.totalorder %s903_s13, %s1218_s1 }
   0x7   :  { %p909_p2 = pnand %p907_p1, %p904_p0 }
   0x9   :  { %912 = shalt.err (!%p909_p2)
}
   0xa   :  { %s913_s18 = scalar_lea.vmem %s34_s10, 2048  ;;  %p918_p4 = scmp.lt.s32.totalorder %s34_s10, %s34_s10 }
   0xb   :  { %p914_p3 = scmp.ne.s32.totalorder %s34_s10, %s913_s18  ;;  %p919_p5 = scmp.lt.s32.totalorder %s913_s18, %s913_s18 }
   0xd   :  { %p920_p6 = por %p919_p5, %p918_p4 }
   0xf   :  { %p921_p7 = pnand %p920_p6, %p914_p3 }
  0x11   :  { %924 = shalt.err (!%p921_p7)
}
  0x12   :  { %s1044_s19 = smov 128   ;;  %s1045_s20 = smov 8  }
  0x13   :  { %39 = dma.hbm_to_vmem [thread:$0]  %s1218_s1, 2048, %s34_s10, [#allocation6], %s1044_s19, %s1044_s19, %s1045_s20  }
  0x14   :  { %s1046_s23 = smov [#allocation8]   ;;  %s1047_s25 = smov [#allocation2]  }
  0x15   :  { %s61_s24 = sshll.u32 %s1046_s23, 4  ;;  %s24_s26 = sshll.u32 %s1047_s25, 4  ;;  %s62_s24 = int_to_ptr.vmem [resolvable:$true] %s61_s24  ;;  %s25_s26 = int_to_ptr.vmem [resolvable:$true] %s24_s26 }
  0x16   :  { %s925_s29 = scalar_lea.hbm %s1222_s5, 1024 }
  0x17   :  { %p926_p8 = scmp.ne.s32.totalorder %s1222_s5, %s925_s29  ;;  %p929_p9 = scmp.lt.u32.totalorder %s925_s29, %s1222_s5 }
  0x19   :  { %p931_p10 = pnand %p929_p9, %p926_p8 }
  0x1b   :  { %934 = shalt.err (!%p931_p10)
}
  0x1c   :  { %s935_s1 = scalar_lea.vmem %s62_s24, 1024  ;;  %p940_p12 = scmp.lt.s32.totalorder %s62_s24, %s62_s24 }
  0x1d   :  { %p936_p11 = scmp.ne.s32.totalorder %s62_s24, %s935_s1  ;;  %p941_p13 = scmp.lt.s32.totalorder %s935_s1, %s935_s1 }
  0x1f   :  { %p942_p0 = por %p941_p13, %p940_p12 }
  0x21   :  { %p943_p1 = pnand %p942_p0, %p936_p11 }
  0x23   :  { %946 = shalt.err (!%p943_p1)
}
  0x24   :  { %s1048_s10 = smov 64   ;;  %s1049_s14 = smov 4  }
  0x25   :  { %67 = dma.hbm_to_vmem [thread:$0]  %s1222_s5, 1024, %s62_s24, [#allocation9], %s1048_s10, %s1048_s10, %s1049_s14  }
  0x26   :  { %s947_s19 = scalar_lea.hbm %s1217_s0, 128 }
  0x27   :  { %p948_p2 = scmp.ne.s32.totalorder %s1217_s0, %s947_s19  ;;  %p951_p3 = scmp.lt.u32.totalorder %s947_s19, %s1217_s0 }
  0x29   :  { %p953_p4 = pnand %p951_p3, %p948_p2 }
  0x2b   :  { %956 = shalt.err (!%p953_p4)
}
  0x2c   :  { %s957_s25 = scalar_lea.vmem %s25_s26, 128  ;;  %p962_p6 = scmp.lt.s32.totalorder %s25_s26, %s25_s26 }
  0x2d   :  { %p958_p5 = scmp.ne.s32.totalorder %s25_s26, %s957_s25  ;;  %p963_p7 = scmp.lt.s32.totalorder %s957_s25, %s957_s25 }
  0x2f   :  { %p964_p8 = por %p963_p7, %p962_p6 }
  0x31   :  { %p965_p9 = pnand %p964_p8, %p958_p5 }
  0x33   :  { %968 = shalt.err (!%p965_p9)
}
  0x34   :  { %27 = dma.hbm_to_vmem [thread:$0]  %s1217_s0, 128, %s25_s26, [#allocation3]  }
  0x35   :  { %s1050_s27 = smov [#allocation7]   ;;  %s1051_s29 = smov [#allocation10]  }
  0x36   :  { %s47_s28 = sshll.u32 %s1050_s27, 4  ;;  %s75_s30 = sshll.u32 %s1051_s29, 4  ;;  %s48_s28 = int_to_ptr.vmem [resolvable:$true] %s47_s28  ;;  %s76_s30 = int_to_ptr.vmem [resolvable:$true] %s75_s30 }
  0x37   :  { %s969_s13 = scalar_lea.hbm %s1220_s3, 2048 }
  0x38   :  { %p970_p10 = scmp.ne.s32.totalorder %s1220_s3, %s969_s13  ;;  %p973_p11 = scmp.lt.u32.totalorder %s969_s13, %s1220_s3 }
  0x3a   :  { %p975_p12 = pnand %p973_p11, %p970_p10 }
  0x3c   :  { %978 = shalt.err (!%p975_p12)
}
  0x3d   :  { %s979_s0 = scalar_lea.vmem %s48_s28, 2048  ;;  %p984_p0 = scmp.lt.s32.totalorder %s48_s28, %s48_s28 }
  0x3e   :  { %p980_p13 = scmp.ne.s32.totalorder %s48_s28, %s979_s0  ;;  %p985_p1 = scmp.lt.s32.totalorder %s979_s0, %s979_s0 }
  0x40   :  { %p986_p2 = por %p985_p1, %p984_p0 }
  0x42   :  { %p987_p3 = pnand %p986_p2, %p980_p13 }
  0x44   :  { %990 = shalt.err (!%p987_p3)
}
  0x45   :  { %53 = dma.hbm_to_vmem [thread:$0]  %s1220_s3, 2048, %s48_s28, [#allocation6], %s1048_s10, %s1048_s10, %s1049_s14  }
  0x46   :  { %s991_s21 = scalar_lea.hbm %s1224_s7, 1024 }
  0x47   :  { %p992_p4 = scmp.ne.s32.totalorder %s1224_s7, %s991_s21  ;;  %p995_p5 = scmp.lt.u32.totalorder %s991_s21, %s1224_s7 }
  0x49   :  { %p997_p6 = pnand %p995_p5, %p992_p4 }
  0x4b   :  { %1000 = shalt.err (!%p997_p6)
}
  0x4c   :  { %s1001_s24 = scalar_lea.vmem %s76_s30, 1024  ;;  %p1006_p8 = scmp.lt.s32.totalorder %s76_s30, %s76_s30 }
  0x4d   :  { %p1002_p7 = scmp.ne.s32.totalorder %s76_s30, %s1001_s24  ;;  %p1007_p9 = scmp.lt.s32.totalorder %s1001_s24, %s1001_s24 }
  0x4f   :  { %p1008_p10 = por %p1007_p9, %p1006_p8 }
  0x51   :  { %p1009_p11 = pnand %p1008_p10, %p1002_p7 }
  0x53   :  { %1012 = shalt.err (!%p1009_p11)
}
  0x54   :  { %81 = dma.hbm_to_vmem [thread:$0]  %s1224_s7, 1024, %s76_s30, [#allocation9], %s1048_s10, %s1048_s10, %s1049_s14  }
  0x55   :  { %1035 = dma.done.wait [#allocation3], 128  }
  0x56   :  { %1036 = vsyncadd [#allocation3], 4294967168 }
  0x57   :  { %1037 = dma.done.wait [#allocation6], 4096  }
  0x58   :  { %1038 = vsyncadd [#allocation6], 4294963200 }
  0x59   :  { %1039 = dma.done.wait [#allocation9], 2048  }
  0x5a   :  { %1040 = vsyncadd [#allocation9], 4294965248  ;;  %v1052_v0 = vmov 0   ;;  %v839_v1 = vld [vmem:[#allocation5 + $0x4] ss:$8 sps:$4 sm:$0xff]   ;;  %v867_v15 = vld [vmem:[#allocation7 + $0x50] sm:$0xff]   ;;  %v120_v38 = vlaneseq }
  0x5b   :  { %242 = vmatprep.mubr.bf16.mxu0 %v1052_v0  ;;  %v841_v2 = vld [vmem:[#allocation5] ss:$8 sps:$4 sm:$0xff]   ;;  %210 = vmatprep.subr.bf16.mxu0 %v839_v1  ;;  %v842_v3 = vld [vmem:[#allocation5 + $0x14] ss:$8 sps:$4 sm:$0xff]   ;;  %v844_v4 = vld [vmem:[#allocation5 + $0x10] ss:$8 sps:$4 sm:$0xff]  }
  0x5c   :  { %211 = vmatpush1.bf16.msra.mxu0 %v841_v2  ;;  %v845_v5 = vld [vmem:[#allocation5 + $0x24] ss:$8 sps:$4 sm:$0xff]   ;;  %v847_v6 = vld [vmem:[#allocation5 + $0x20] ss:$8 sps:$4 sm:$0xff]   ;;  %v848_v7 = vld [vmem:[#allocation5 + $0x34] ss:$8 sps:$4 sm:$0xff]  }
  0x5d   :  { %212 = vmatprep.subr.bf16.mxu0 %v842_v3  ;;  %v850_v8 = vld [vmem:[#allocation5 + $0x30] ss:$8 sps:$4 sm:$0xff]   ;;  %v851_v9 = vld [vmem:[#allocation5 + $0x44] ss:$8 sps:$4 sm:$0xff]   ;;  %v853_v12 = vld [vmem:[#allocation5 + $0x40] ss:$8 sps:$4 sm:$0xff]  }
  0x5e   :  { %v863_v10 = vld [vmem:[#allocation7 + $0x40] sm:$0xff]   ;;  %v865_v13 = vld [vmem:[#allocation7 + $0x48] sm:$0xff]   ;;  %v854_v16 = vld [vmem:[#allocation5 + $0x54] ss:$8 sps:$4 sm:$0xff]   ;;  %v1053_v36 = vmov 0.0   ;;  %v121_v39 = vshrl.u32 %v120_v38, 7 }
  0x5f   :  { %v864_v11 = vld [vmem:[#allocation7] sm:$0xff]   ;;  %746 = vmatprep.subr.bf16.mxu1 %v863_v10  ;;  %v866_v14 = vld [vmem:[#allocation7 + $0x8] sm:$0xff]   ;;  %v856_v17 = vld [vmem:[#allocation5 + $0x50] ss:$8 sps:$4 sm:$0xff]   ;;  %vm1054_vm2 = vmmov 0   ;;  %s1055_s11 = smov [#allocation11]  }
  0x60   :  { %213 = vmatpush1.bf16.msra.mxu0 %v844_v4  ;;  %747 = vmatpush3.bf16.msra.mxu1 %v864_v11  ;;  %v857_v18 = vld [vmem:[#allocation5 + $0x64] ss:$8 sps:$4 sm:$0xff]   ;;  %v859_v19 = vld [vmem:[#allocation5 + $0x60] ss:$8 sps:$4 sm:$0xff]   ;;  %v860_v20 = vld [vmem:[#allocation5 + $0x74] ss:$8 sps:$4 sm:$0xff]  }
  0x61   :  { %214 = vmatprep.subr.bf16.mxu0 %v845_v5  ;;  %748 = vmatprep.subr.bf16.mxu1 %v865_v13  ;;  %v862_v21 = vld [vmem:[#allocation5 + $0x70] ss:$8 sps:$4 sm:$0xff]   ;;  %v871_v27 = vld [vmem:[#allocation7 + $0x60] sm:$0xff]   ;;  %v873_v29 = vld [vmem:[#allocation7 + $0x68] sm:$0xff]   ;;  %v122_v40 = vsub.s32 0, %v121_v39  ;;  %v126_v42 = vsub.s32 1, %v121_v39 }
  0x62   :  { %v100_v22 = vld [vmem:[#allocation2] sm:$0xff]  ;;  %v868_v24 = vld [vmem:[#allocation7 + $0x10] sm:$0xff]   ;;  %v872_v28 = vld [vmem:[#allocation7 + $0x20] sm:$0xff]  }
  0x63   :  { %v101_v23 = vpack.c.bf16 %v100_v22, %v100_v22  ;;  %v869_v25 = vld [vmem:[#allocation7 + $0x58] sm:$0xff]   ;;  %v874_v30 = vld [vmem:[#allocation7 + $0x28] sm:$0xff]   ;;  %v875_v31 = vld [vmem:[#allocation7 + $0x70] sm:$0xff]  }
  0x64   :  { %215 = vmatpush1.bf16.msra.mxu0 %v847_v6  ;;  %749 = vmatpush3.bf16.msra.mxu1 %v866_v14  ;;  %v870_v26 = vld [vmem:[#allocation7 + $0x18] sm:$0xff]   ;;  %v876_v32 = vld [vmem:[#allocation7 + $0x30] sm:$0xff]   ;;  %v879_v35 = vld [vmem:[#allocation8] sm:$0xff]  }
  0x65   :  { %216 = vmatprep.subr.bf16.mxu0 %v848_v7  ;;  %750 = vmatprep.subr.bf16.mxu1 %v867_v15  ;;  %v877_v33 = vld [vmem:[#allocation7 + $0x78] sm:$0xff]   ;;  %v880_v37 = vld [vmem:[#allocation8 + $0x8] sm:$0xff]   ;;  %v881_v61 = vld [vmem:[#allocation8 + $0x10] sm:$0xff]  }
  0x66   :  { %v878_v34 = vld [vmem:[#allocation7 + $0x38] sm:$0xff]   ;;  %v883_v63 = vld [vmem:[#allocation8 + $0x20] sm:$0xff]   ;;  %v884_v0 = vld [vmem:[#allocation8 + $0x28] sm:$0xff]  }
  0x67   :  { %v118_v41 = vld [vmem:[%s1219_s2] sm:$0x3]  ;;  %v885_v1 = vld [vmem:[#allocation8 + $0x30] sm:$0xff]   ;;  %v887_v3 = vld [vmem:[#allocation10] sm:$0xff]  }
  0x68   :  { %217 = vmatpush1.bf16.msra.mxu0 %v850_v8  ;;  %751 = vmatpush3.bf16.msra.mxu1 %v868_v24  ;;  %v123_v43 = vrot.slane %v118_v41, %v122_v40  ;;  %v127_v44 = vrot.slane %v118_v41, %v126_v42  ;;  %v882_v62 = vld [vmem:[#allocation8 + $0x18] sm:$0xff]   ;;  %v888_v4 = vld [vmem:[#allocation10 + $0x8] sm:$0xff]   ;;  %v889_v5 = vld [vmem:[#allocation10 + $0x10] sm:$0xff]  }
  0x69   :  { %218 = vmatprep.subr.bf16.mxu0 %v851_v9  ;;  %752 = vmatprep.subr.bf16.mxu1 %v869_v25  ;;  %v886_v2 = vld [vmem:[#allocation8 + $0x38] sm:$0xff]  }
  0x6a   :  { %v709_v7 = vld [vmem:[%s1221_s4] ss:$0 sm:$0xff] }
  0x6b   :  { %v894_v22 = vld [vmem:[#allocation10 + $0x38] sm:$0xff]  }
  0x6c   :  { %219 = vmatpush1.bf16.msra.mxu0 %v853_v12  ;;  %753 = vmatpush3.bf16.msra.mxu1 %v870_v26 }
  0x6d   :  { %220 = vmatprep.subr.bf16.mxu0 %v854_v16  ;;  %754 = vmatprep.subr.bf16.mxu1 %v871_v27 }
  0x70   :  { %221 = vmatpush1.bf16.msra.mxu0 %v856_v17  ;;  %755 = vmatpush3.bf16.msra.mxu1 %v872_v28 }
  0x71   :  { %222 = vmatprep.subr.bf16.mxu0 %v857_v18  ;;  %756 = vmatprep.subr.bf16.mxu1 %v873_v29  ;;  %v890_v18 = vld [vmem:[#allocation10 + $0x18] sm:$0xff]  }
  0x74   :  { %223 = vmatpush1.bf16.msra.mxu0 %v859_v19  ;;  %757 = vmatpush3.bf16.msra.mxu1 %v874_v30  ;;  %v891_v19 = vld [vmem:[#allocation10 + $0x20] sm:$0xff]  }
  0x75   :  { %224 = vmatprep.subr.bf16.mxu0 %v860_v20  ;;  %758 = vmatprep.subr.bf16.mxu1 %v875_v31  ;;  %v892_v20 = vld [vmem:[#allocation10 + $0x28] sm:$0xff]  }
  0x78   :  { %225 = vmatpush1.bf16.msra.mxu0 %v862_v21  ;;  %759 = vmatpush3.bf16.msra.mxu1 %v876_v32  ;;  %v893_v21 = vld [vmem:[#allocation10 + $0x30] sm:$0xff]  }
  0x79   :  { %760 = vmatprep.subr.bf16.mxu1 %v877_v33  ;;  %786 = vmatprep.subr.bf16.mxu0 %v1053_v36 }
  0x7b   :  { %243 = vmatmul.mubr.bf16.vlgmr.msra.gmra.mrb[0].mxu0 %v101_v23  ;;  %v727_v23 = vld [vmem:[%s1223_s6] ss:$0 sm:$0xff]  ;;  %s680_s6 = sshll.u32 %s1055_s11, 4  ;;  %s681_s6 = int_to_ptr.vmem [resolvable:$true] %s680_s6 }
  0x7c   :  { %761 = vmatpush3.bf16.msra.mxu1 %v878_v34  ;;  %787 = vmatpush3.bf16.msra.mxu0 %v879_v35  ;;  %v737_v34 = vld [vmem:[%s1225_s8] ss:$0 sm:$0xff]  ;;  %s1013_s12 = scalar_lea.vmem %s681_s6, 64  ;;  %p1018_p13 = scmp.lt.s32.totalorder %s681_s6, %s681_s6 }
  0x7d   :  { %806 = vmatprep.subr.bf16.mxu1 %v1053_v36  ;;  %788 = vmatprep.subr.bf16.mxu0 %v1053_v36  ;;  %p1014_p12 = scmp.ne.s32.totalorder %s681_s6, %s1013_s12  ;;  %p1019_p0 = scmp.lt.s32.totalorder %s1013_s12, %s1013_s12 }
  0x7e   :  { %802 = vmatprep.mubr.msk.bf16.mxu0 %vm1054_vm2, %v1053_v36 }
  0x7f   :  { %p1020_p1 = por %p1019_p0, %p1018_p13 }
  0x80   :  { %789 = vmatpush3.bf16.msra.mxu0 %v880_v37 }
  0x81   :  { %790 = vmatprep.subr.bf16.mxu0 %v1053_v36  ;;  %p1021_p2 = pnand %p1020_p1, %p1014_p12 }
  0x84   :  { %791 = vmatpush3.bf16.msra.mxu0 %v881_v61 }
  0x85   :  { %792 = vmatprep.subr.bf16.mxu0 %v1053_v36 }
  0x88   :  { %793 = vmatpush3.bf16.msra.mxu0 %v882_v62 }
  0x89   :  { %794 = vmatprep.subr.bf16.mxu0 %v1053_v36 }
  0x8c   :  { %795 = vmatpush3.bf16.msra.mxu0 %v883_v63 }
  0x8d   :  { %796 = vmatprep.subr.bf16.mxu0 %v1053_v36 }
  0x90   :  { %797 = vmatpush3.bf16.msra.mxu0 %v884_v0 }
  0x91   :  { %798 = vmatprep.subr.bf16.mxu0 %v1053_v36 }
  0x94   :  { %799 = vmatpush3.bf16.msra.mxu0 %v885_v1 }
  0x95   :  { %800 = vmatprep.subr.bf16.mxu0 %v1053_v36 }
  0x98   :  { %801 = vmatpush3.bf16.msra.mxu0 %v886_v2 }
 0x14e   :  { %v244_v45 = vpop.f32.mrb[0].mxu0 }
 0x14f   :  { %v245_v46 = vadd.f32 %v244_v45, %v123_v43  ;;  %v246_v47 = vpop.f32.mrb[1].mxu0 }
 0x150   :  { %v247_v48 = vadd.f32 %v246_v47, %v127_v44  ;;  %v248_v49 = vpop.f32.mrb[2].mxu0 }
 0x151   :  { %v253_v50 = vmul.f32 1.442695, %v245_v46  ;;  %v249_v51 = vpop.f32.mrb[3].mxu0  ;;  %vm251_vm0 = vcmp.gt.f32.partialorder %v245_v46, 0.0 }
 0x152   :  { %v255_v52 = vmul.f32 1.442695, %v247_v48  ;;  %vm252_vm1 = vcmp.gt.f32.partialorder %v247_v48, 0.0 }
 0x153   :  { %895 = vpow2.f32 %v253_v50 }
 0x154   :  { %897 = vpow2.f32 %v255_v52 }
 0x15d   :  { %v896_v53 = vpop.eup %895 }
 0x15e   :  { %v898_v54 = vpop.eup %897  ;;  %v707_v55 = vadd.f32 -1.0, %v896_v53 }
 0x15f   :  { %v708_v56 = vadd.f32 -1.0, %v898_v54 }
 0x160   :  { %v259_v57 = vsel %vm251_vm0, %v245_v46, %v707_v55 }
 0x161   :  { %v260_v58 = vsel %vm252_vm1, %v247_v48, %v708_v56  ;;  %v261_v60 = vpack.c.bf16 %v259_v57, %v259_v57 }
 0x162   :  { %v262_v59 = vpack.c.bf16 %v260_v58, %v260_v58 }
 0x164   :  { %430 = vmatprep.mubr.bf16.mxu1 %v262_v59 }
 0x165   :  { %431 = vmatmul.mubr.bf16.vlgmr.msra.gmra.mrb[0].mxu1 %v261_v60 }
 0x166   :  { %822 = vmatprep.mubr.msk.bf16.mxu1 %vm1054_vm2, %v1053_v36  ;;  %807 = vmatpush3.bf16.msra.mxu1 %v887_v3 }
 0x167   :  { %808 = vmatprep.subr.bf16.mxu1 %v1053_v36 }
 0x16a   :  { %809 = vmatpush3.bf16.msra.mxu1 %v888_v4 }
 0x16b   :  { %810 = vmatprep.subr.bf16.mxu1 %v1053_v36 }
 0x16e   :  { %811 = vmatpush3.bf16.msra.mxu1 %v889_v5 }
 0x16f   :  { %812 = vmatprep.subr.bf16.mxu1 %v1053_v36 }
 0x172   :  { %813 = vmatpush3.bf16.msra.mxu1 %v890_v18 }
 0x173   :  { %814 = vmatprep.subr.bf16.mxu1 %v1053_v36 }
 0x176   :  { %815 = vmatpush3.bf16.msra.mxu1 %v891_v19 }
 0x177   :  { %816 = vmatprep.subr.bf16.mxu1 %v1053_v36 }
 0x17a   :  { %817 = vmatpush3.bf16.msra.mxu1 %v892_v20 }
 0x17b   :  { %818 = vmatprep.subr.bf16.mxu1 %v1053_v36 }
 0x17e   :  { %819 = vmatpush3.bf16.msra.mxu1 %v893_v21 }
 0x17f   :  { %820 = vmatprep.subr.bf16.mxu1 %v1053_v36 }
 0x182   :  { %821 = vmatpush3.bf16.msra.mxu1 %v894_v22 }
 0x238   :  { %v762_v6 = vpop.f32.mrb[0].mxu1 }
 0x239   :  { %v763_v8 = vpop.f32.mrb[1].mxu1 }
 0x23a   :  { %v764_v9 = vadd.f32 %v763_v8, %v762_v6  ;;  %v765_v10 = vpop.f32.mrb[2].mxu1 }
 0x23b   :  { %v766_v11 = vpop.f32.mrb[3].mxu1 }
 0x23c   :  { %v433_v12 = vadd.f32 %v764_v9, %v709_v7 }
 0x23e   :  { %v439_v13 = vmul.f32 1.442695, %v433_v12  ;;  %vm438_vm3 = vcmp.gt.f32.partialorder %v433_v12, 0.0 }
 0x240   :  { %899 = vpow2.f32 %v439_v13 }
 0x24a   :  { %v900_v14 = vpop.eup %899 }
 0x24b   :  { %v726_v15 = vadd.f32 -1.0, %v900_v14 }
 0x24d   :  { %v442_v16 = vsel %vm438_vm3, %v433_v12, %v726_v15 }
 0x24e   :  { %v443_v17 = vpack.c.bf16 %v442_v16, %v442_v16 }
 0x250   :  { %803 = vmatmul.mubr.bf16.vlgmr.msra.gmra.mrb[4].mxu0 %v443_v17 }
 0x323   :  { %v549_v24 = vpop.f32.mrb[4].mxu0 }
 0x324   :  { %v550_v25 = vadd.f32 %v727_v23, %v549_v24  ;;  %v804_v26 = vpop.f32.mrb[5].mxu0 }
 0x325   :  { %v552_v27 = vpop.f32.mrb[6].mxu0 }
 0x326   :  { %v556_v28 = vmul.f32 1.442695, %v550_v25  ;;  %v805_v29 = vpop.f32.mrb[7].mxu0  ;;  %vm555_vm4 = vcmp.gt.f32.partialorder %v550_v25, 0.0 }
 0x328   :  { %901 = vpow2.f32 %v556_v28 }
 0x332   :  { %v902_v30 = vpop.eup %901 }
 0x333   :  { %v736_v31 = vadd.f32 -1.0, %v902_v30 }
 0x335   :  { %v559_v32 = vsel %vm555_vm4, %v550_v25, %v736_v31 }
 0x336   :  { %v560_v33 = vpack.c.bf16 %v559_v32, %v559_v32 }
 0x338   :  { %823 = vmatmul.mubr.bf16.vlgmr.msra.gmra.mrb[4].mxu1 %v560_v33 }
 0x40b   :  { %v666_v35 = vpop.f32.mrb[4].mxu1 }
 0x40c   :  { %v667_v36 = vadd.f32 %v737_v34, %v666_v35  ;;  %v824_v37 = vpop.f32.mrb[5].mxu1 }
 0x40d   :  { %v669_v38 = vpop.f32.mrb[6].mxu1 }
 0x40e   :  { %v672_v39 = vpack.c.bf16 %v667_v36, %v667_v36  ;;  %v825_v40 = vpop.f32.mrb[7].mxu1 }
 0x410   :  { %673 = vst [vmem:[#allocation11] sm:$0xf] %v672_v39 }
 0x411   :  { %1024 = shalt.err (!%p1021_p2)
}
 0x412   :  { %s1025_s8 = scalar_lea.hbm %s1226_s9, 64 }
 0x413   :  { %p1026_p3 = scmp.ne.s32.totalorder %s1226_s9, %s1025_s8  ;;  %p1029_p4 = scmp.lt.u32.totalorder %s1025_s8, %s1226_s9 }
 0x415   :  { %p1031_p5 = pnand %p1029_p4, %p1026_p3 }
 0x417   :  { %1034 = shalt.err (!%p1031_p5)
}
 0x418   :  { %683 = dma.vmem_to_hbm [thread:$0]  %s681_s6, 64, %s1226_s9, [#allocation4]  }
 0x419   :  { %1041 = dma.done.wait [#allocation4], 64  }
 0x41a   :  { %1042 = vsyncadd [#allocation4], 4294967232 }
 0x41b   :  { %687 = vsyncpa [#allocation3], 1 }
 0x41c   :  { %688 = vsyncpa [#allocation6], 1 }
 0x41d   :  { %689 = vsyncpa [#allocation9], 1 }
 0x41e   :  { %690 = vsyncpa [#allocation4], 1 }

</bundles_post_ra>
